<compile_context>
chip_gen: v7x
topology: tpu7x:2x2x1
jax: 0.10.0
libtpu: 0.0.40
codegen_flags: <defaults>
</compile_context>

<pallas_src>
import functools

import jax
import jax.numpy as jnp
import numpy as np
from jax.experimental import pallas as pl
from jax.experimental.pallas import tpu as pltpu

EPS = 1e-5  # PyTorch BatchNorm1d default eps


def _round_up(n, m):
    return ((n + m - 1) // m) * m


def _gelu_tanh(x):
    # nn.GELU(approximate='tanh'):  0.5*x*(1 + tanh(sqrt(2/pi)*(x + 0.044715*x^3)))
    c = 0.7978845608028654  # sqrt(2/pi)
    return 0.5 * x * (1.0 + jnp.tanh(c * (x + 0.044715 * x * x * x)))


def _conv_block_kernel(xm_ref, xh_ref, w_ref, shift_ref, o_ref):
    # xm_ref    : (1, R, TL)    bf16  phase-layout slab (R = Cin*S, lanes = out time)
    # xh_ref    : (1, R, 128)   bf16  halo: next 128 time columns of the same array
    # w_ref     : (Kj, Cout, R) bf16  folded (in_proj . conv . BN-scale) weights
    # shift_ref : (Cout, 1)     f32   BatchNorm1d(eval) shift
    # o_ref     : (1, Cout, TL) f32
    tl = o_ref.shape[-1]
    combined = jnp.concatenate([xm_ref[0], xh_ref[0]], axis=-1)       # (R, TL+128)
    # K/S shifted views of the (unduplicated) slab, accumulated on the MXU.
    acc = jnp.dot(w_ref[0], combined[:, :tl], preferred_element_type=jnp.float32)
    for j in range(1, w_ref.shape[0]):                                # static unroll
        acc = acc + jnp.dot(w_ref[j], combined[:, j:j + tl],
                            preferred_element_type=jnp.float32)
    y = acc + shift_ref[...]                         # BN shift (scale is in weights)
    o_ref[0] = _gelu_tanh(y).astype(o_ref.dtype)     # GELU (tanh approx)


@functools.partial(jax.jit, static_argnames=("kernel_size", "stride"))
def conv_block_forward(x, params, *, kernel_size, stride):
    """ConvBlock forward.  x: (B, Cin, L) f32 (NCW) -> (B, Cout, ceil(L/S)) f32."""
    K, S = kernel_size, stride
    if K < S:
        raise ValueError("`kernel_size` must be >= `stride` (see _auto_pad_1d).")
    w_in, w_conv = params["w_in"], params["w_conv"]
    B, Cin, L = x.shape
    Cout = w_conv.shape[0]

    # ---- _auto_pad_1d: output length = ceil(L/S).  in_proj is a bias-free 1x1,
    # so zero-padding the raw input commutes exactly with it.
    pds = (S - L % S) % S + K - S
    left = pds // 2
    Lp = L + pds
    Lout = (Lp - K) // S + 1

    # ---- stride-phase decomposition sizes (k = j*S + s).
    Kj = -(-K // S)                       # ceil(K/S) phases
    assert Kj - 1 <= 128, "halo wider than 128 output columns not supported"
    U = Lout + Kj - 1                     # phase-time columns holding real data
    Lraw = S * U                          # >= Lp; extra tail only meets zero weights
    R = Cin * S

    # ---- time tiling: lane-dense (multiple of 128), capped at 2048, and split
    # so the grid has >= 2 steps whenever possible (v7x megacore).
    TL = min(2048, _round_up(Lout, 128))
    if B * (_round_up(Lout, TL) // TL) < 2 and TL > 128:
        TL = _round_up(-(-Lout // 2), 128)
    Lout_pad = _round_up(Lout, TL)
    n_tiles = Lout_pad // TL
    T_pad = Lout_pad + 128                # room for the last tile's halo block

    # ---- phase-layout activations, built ONCE (layout only, no K/S duplication):
    # xph[b, ci*S + s, u] = x_padded[b, ci, S*u + s]
    x_pad = jnp.pad(x, ((0, 0), (0, 0), (left, Lraw - L - left)))
    xph = jnp.transpose(x_pad.reshape(B, Cin, U, S), (0, 1, 3, 2)).reshape(B, R, U)
    xph = jnp.pad(xph, ((0, 0), (0, 0), (0, T_pad - U))).astype(jnp.bfloat16)

    # ---- fold bias-free 1x1 in_proj and BN(eval) scale into the conv weight.
    w_fold = jnp.einsum("omk,mi->oik", w_conv, w_in[..., 0])           # (Cout,Cin,K)
    scale = params["gamma"] / jnp.sqrt(params["var"] + EPS)            # (Cout,)
    shift = (params["beta"] - params["mean"] * scale).reshape(Cout, 1)
    w_fold = w_fold * scale[:, None, None]
    w_pad = jnp.pad(w_fold, ((0, 0), (0, 0), (0, Kj * S - K)))         # zero taps
    w_ph = jnp.transpose(w_pad.reshape(Cout, Cin, Kj, S), (2, 0, 1, 3))
    w_ph = w_ph.reshape(Kj, Cout, R).astype(jnp.bfloat16)              # (Kj,Cout,R)

    tlb = TL // 128
    out = pl.pallas_call(
        _conv_block_kernel,
        out_shape=jax.ShapeDtypeStruct((B, Cout, Lout_pad), jnp.float32),
        grid_spec=pltpu.PrefetchScalarGridSpec(
            num_scalar_prefetch=0,
            grid=(B, n_tiles),
            in_specs=[
                pl.BlockSpec((1, R, TL), lambda b, i: (b, 0, i)),              # slab
                pl.BlockSpec((1, R, 128), lambda b, i: (b, 0, (i + 1) * tlb)),  # halo
                pl.BlockSpec((Kj, Cout, R), lambda b, i: (0, 0, 0)),           # weights
                pl.BlockSpec((Cout, 1), lambda b, i: (0, 0)),                  # BN shift
            ],
            out_specs=pl.BlockSpec((1, Cout, TL), lambda b, i: (b, 0, i)),
        ),
        compiler_params=pltpu.CompilerParams(
            dimension_semantics=("parallel", "parallel"),
            vmem_limit_bytes=32 * 1024 * 1024),
    )(xph, xph, w_ph, shift)

    # ---- drop time padding; output is already channels-first (NCW).
    return out[:, :, :Lout]


def _reference(x, params, kernel_size, stride):
    """Pure-JAX f32 reference matching the PyTorch module (eval-mode BN, tanh-GELU)."""
    K, S = kernel_size, stride
    dn = ("NCH", "OIH", "NCH")
    hp = jax.lax.Precision.HIGHEST
    y = jax.lax.conv_general_dilated(x, params["w_in"], (1,), "VALID",
                                     dimension_numbers=dn, precision=hp)
    L = y.shape[-1]
    pds = (S - L % S) % S + K - S
    y = jnp.pad(y, ((0, 0), (0, 0), (pds // 2, pds - pds // 2)))
    y = jax.lax.conv_general_dilated(y, params["w_conv"], (S,), "VALID",
                                     dimension_numbers=dn, precision=hp)
    scale = params["gamma"] / jnp.sqrt(params["var"] + EPS)
    shift = params["beta"] - params["mean"] * scale
    y = y * scale[None, :, None] + shift[None, :, None]
    return _gelu_tanh(y)


if __name__ == "__main__":
    B, C_IN, C_OUT, L = 2, 8, 16, 101       # small shapes; L not a multiple of stride
    KS, ST = 16, 4                          # kernel_size=16, stride=4

    key = jax.random.PRNGKey(0)
    ks = jax.random.split(key, 7)
    x = jax.random.normal(ks[0], (B, C_IN, L), jnp.float32)
    params = {
        "w_in":   (1.0 / np.sqrt(C_IN)) *
                  jax.random.normal(ks[1], (C_IN, C_IN, 1), jnp.float32),
        "w_conv": (1.0 / np.sqrt(C_IN * KS)) *
                  jax.random.normal(ks[2], (C_OUT, C_IN, KS), jnp.float32),
        "gamma":  1.0 + 0.1 * jax.random.normal(ks[3], (C_OUT,), jnp.float32),
        "beta":   0.1 * jax.random.normal(ks[4], (C_OUT,), jnp.float32),
        "mean":   0.1 * jax.random.normal(ks[5], (C_OUT,), jnp.float32),
        "var":    jnp.abs(1.0 + 0.1 * jax.random.normal(ks[6], (C_OUT,), jnp.float32)),
    }

    out = conv_block_forward(x, params, kernel_size=KS, stride=ST)
    jax.block_until_ready(out)

    Lout = -(-L // ST)                      # ceil(L / stride)
    assert out.shape == (B, C_OUT, Lout), out.shape

    ref = _reference(x, params, KS, ST)
    np.testing.assert_allclose(np.asarray(out), np.asarray(ref), rtol=2e-2, atol=2e-2)

    print("KERNEL_OK")
</pallas_src>

<mosaic_0001>
module attributes {stable_mosaic.version = 11 : i64} {
  func.func @_conv_block_kernel(%arg0: i32, %arg1: i32, %arg2: memref<1x32x128xbf16, #tpu.memory_space<vmem>>, %arg3: memref<1x32x128xbf16, #tpu.memory_space<vmem>>, %arg4: memref<4x16x32xbf16, #tpu.memory_space<vmem>>, %arg5: memref<16x1xf32, #tpu.memory_space<vmem>>, %arg6: memref<1x16x128xf32, #tpu.memory_space<vmem>>) attributes {dimension_semantics = [#tpu.dimension_semantics<parallel>, #tpu.dimension_semantics<parallel>], iteration_bounds = array<i64: 2, 1>, scalar_prefetch = 0 : i64, scratch_operands = 0 : i64, tpu.core_type = #tpu.core_type<tc>, window_params = [{transform_indices = @transform_0, window_bounds = array<i64: 1, 32, 128>}, {transform_indices = @transform_1, window_bounds = array<i64: 1, 32, 128>}, {pipeline_mode = #tpu.pipeline_mode<synchronous>, transform_indices = @transform_2, window_bounds = array<i64: 4, 16, 32>}, {pipeline_mode = #tpu.pipeline_mode<synchronous>, transform_indices = @transform_3, window_bounds = array<i64: 16, 1>}, {transform_indices = @transform_4, window_bounds = array<i64: 1, 16, 128>}]} {
    %c0 = arith.constant 0 : index
    %c0_0 = arith.constant 0 : index
    %c0_1 = arith.constant 0 : index
    %0 = vector.load %arg2[%c0, %c0_0, %c0_1] : memref<1x32x128xbf16, #tpu.memory_space<vmem>>, vector<1x32x128xbf16>
    %1 = vector.shape_cast %0 : vector<1x32x128xbf16> to vector<32x128xbf16>
    %c0_2 = arith.constant 0 : index
    %c0_3 = arith.constant 0 : index
    %c0_4 = arith.constant 0 : index
    %2 = vector.load %arg3[%c0_2, %c0_3, %c0_4] : memref<1x32x128xbf16, #tpu.memory_space<vmem>>, vector<1x32x128xbf16>
    %3 = vector.shape_cast %2 : vector<1x32x128xbf16> to vector<32x128xbf16>
    %4 = tpu.concatenate %1, %3 in 1 : vector<32x128xbf16>, vector<32x128xbf16> -> vector<32x256xbf16>
    %c0_5 = arith.constant 0 : index
    %c0_6 = arith.constant 0 : index
    %c0_7 = arith.constant 0 : index
    %5 = vector.load %arg4[%c0_5, %c0_6, %c0_7] : memref<4x16x32xbf16, #tpu.memory_space<vmem>>, vector<1x16x32xbf16>
    %6 = vector.shape_cast %5 : vector<1x16x32xbf16> to vector<16x32xbf16>
    %7 = vector.extract_strided_slice %4 {offsets = [0, 0], sizes = [32, 128], strides = [1, 1]} : vector<32x256xbf16> to vector<32x128xbf16>
    %cst = arith.constant dense<0.000000e+00> : vector<16x128xf32>
    %8 = tpu.matmul %6, %7, %cst {dimension_numbers = #tpu.dot_dimension_numbers<[1], [0], [0], [1], [0, 0, 1, 1], [], []>} : vector<16x32xbf16>, vector<32x128xbf16>, vector<16x128xf32> -> vector<16x128xf32>
    %c1 = arith.constant 1 : index
    %c0_8 = arith.constant 0 : index
    %c0_9 = arith.constant 0 : index
    %9 = vector.load %arg4[%c1, %c0_8, %c0_9] : memref<4x16x32xbf16, #tpu.memory_space<vmem>>, vector<1x16x32xbf16>
    %10 = vector.shape_cast %9 : vector<1x16x32xbf16> to vector<16x32xbf16>
    %11 = vector.extract_strided_slice %4 {offsets = [0, 1], sizes = [32, 128], strides = [1, 1]} : vector<32x256xbf16> to vector<32x128xbf16>
    %cst_10 = arith.constant dense<0.000000e+00> : vector<16x128xf32>
    %12 = tpu.matmul %10, %11, %cst_10 {dimension_numbers = #tpu.dot_dimension_numbers<[1], [0], [0], [1], [0, 0, 1, 1], [], []>} : vector<16x32xbf16>, vector<32x128xbf16>, vector<16x128xf32> -> vector<16x128xf32>
    %13 = arith.addf %8, %12 : vector<16x128xf32>
    %c2 = arith.constant 2 : index
    %c0_11 = arith.constant 0 : index
    %c0_12 = arith.constant 0 : index
    %14 = vector.load %arg4[%c2, %c0_11, %c0_12] : memref<4x16x32xbf16, #tpu.memory_space<vmem>>, vector<1x16x32xbf16>
    %15 = vector.shape_cast %14 : vector<1x16x32xbf16> to vector<16x32xbf16>
    %16 = vector.extract_strided_slice %4 {offsets = [0, 2], sizes = [32, 128], strides = [1, 1]} : vector<32x256xbf16> to vector<32x128xbf16>
    %cst_13 = arith.constant dense<0.000000e+00> : vector<16x128xf32>
    %17 = tpu.matmul %15, %16, %cst_13 {dimension_numbers = #tpu.dot_dimension_numbers<[1], [0], [0], [1], [0, 0, 1, 1], [], []>} : vector<16x32xbf16>, vector<32x128xbf16>, vector<16x128xf32> -> vector<16x128xf32>
    %18 = arith.addf %13, %17 : vector<16x128xf32>
    %c3 = arith.constant 3 : index
    %c0_14 = arith.constant 0 : index
    %c0_15 = arith.constant 0 : index
    %19 = vector.load %arg4[%c3, %c0_14, %c0_15] : memref<4x16x32xbf16, #tpu.memory_space<vmem>>, vector<1x16x32xbf16>
    %20 = vector.shape_cast %19 : vector<1x16x32xbf16> to vector<16x32xbf16>
    %21 = vector.extract_strided_slice %4 {offsets = [0, 3], sizes = [32, 128], strides = [1, 1]} : vector<32x256xbf16> to vector<32x128xbf16>
    %cst_16 = arith.constant dense<0.000000e+00> : vector<16x128xf32>
    %22 = tpu.matmul %20, %21, %cst_16 {dimension_numbers = #tpu.dot_dimension_numbers<[1], [0], [0], [1], [0, 0, 1, 1], [], []>} : vector<16x32xbf16>, vector<32x128xbf16>, vector<16x128xf32> -> vector<16x128xf32>
    %23 = arith.addf %18, %22 : vector<16x128xf32>
    %c0_17 = arith.constant 0 : index
    %c0_18 = arith.constant 0 : index
    %24 = vector.load %arg5[%c0_17, %c0_18] : memref<16x1xf32, #tpu.memory_space<vmem>>, vector<16x1xf32>
    %25 = vector.broadcast %24 : vector<16x1xf32> to vector<16x128xf32>
    %26 = arith.addf %23, %25 : vector<16x128xf32>
    %cst_19 = arith.constant 5.000000e-01 : f32
    %27 = vector.broadcast %cst_19 : f32 to vector<16x128xf32>
    %28 = arith.mulf %27, %26 : vector<16x128xf32>
    %cst_20 = arith.constant 4.471500e-02 : f32
    %29 = vector.broadcast %cst_20 : f32 to vector<16x128xf32>
    %30 = arith.mulf %29, %26 : vector<16x128xf32>
    %31 = arith.mulf %30, %26 : vector<16x128xf32>
    %32 = arith.mulf %31, %26 : vector<16x128xf32>
    %33 = arith.addf %26, %32 : vector<16x128xf32>
    %cst_21 = arith.constant 0.797884583 : f32
    %34 = vector.broadcast %cst_21 : f32 to vector<16x128xf32>
    %35 = arith.mulf %34, %33 : vector<16x128xf32>
    %36 = math.tanh %35 : vector<16x128xf32>
    %cst_22 = arith.constant 1.000000e+00 : f32
    %37 = vector.broadcast %cst_22 : f32 to vector<16x128xf32>
    %38 = arith.addf %37, %36 : vector<16x128xf32>
    %39 = arith.mulf %28, %38 : vector<16x128xf32>
    %c0_23 = arith.constant 0 : index
    %c0_24 = arith.constant 0 : index
    %c0_25 = arith.constant 0 : index
    %40 = vector.load %arg6[%c0_23, %c0_24, %c0_25] : memref<1x16x128xf32, #tpu.memory_space<vmem>>, vector<1x16x128xf32>
    %41 = vector.shape_cast %40 : vector<1x16x128xf32> to vector<16x128xf32>
    %42 = vector.shape_cast %39 : vector<16x128xf32> to vector<1x16x128xf32>
    tpu.vector_store %arg6[%c0_23, %c0_24, %c0_25], %42 {strides = array<i32>} : memref<1x16x128xf32, #tpu.memory_space<vmem>>, vector<1x16x128xf32>,
    return
  }
  func.func @transform_0(%arg0: i32, %arg1: i32) -> (i32, i32, i32) {
    %c0_i32 = arith.constant 0 : i32
    %c0_i32_0 = arith.constant 0 : i32
    return %arg0, %c0_i32, %arg1 : i32, i32, i32
  }
  func.func @transform_1(%arg0: i32, %arg1: i32) -> (i32, i32, i32) {
    %c1_i32 = arith.constant 1 : i32
    %0 = arith.addi %arg1, %c1_i32 : i32
    %c1_i32_0 = arith.constant 1 : i32
    %1 = arith.muli %0, %c1_i32_0 : i32
    %c0_i32 = arith.constant 0 : i32
    %c0_i32_1 = arith.constant 0 : i32
    return %arg0, %c0_i32, %1 : i32, i32, i32
  }
  func.func @transform_2(%arg0: i32, %arg1: i32) -> (i32, i32, i32) {
    %c0_i32 = arith.constant 0 : i32
    %c0_i32_0 = arith.constant 0 : i32
    %c0_i32_1 = arith.constant 0 : i32
    %c0_i32_2 = arith.constant 0 : i32
    return %c0_i32, %c0_i32_0, %c0_i32_1 : i32, i32, i32
  }
  func.func @transform_3(%arg0: i32, %arg1: i32) -> (i32, i32) {
    %c0_i32 = arith.constant 0 : i32
    %c0_i32_0 = arith.constant 0 : i32
    %c0_i32_1 = arith.constant 0 : i32
    return %c0_i32, %c0_i32_0 : i32, i32
  }
  func.func @transform_4(%arg0: i32, %arg1: i32) -> (i32, i32, i32) {
    %c0_i32 = arith.constant 0 : i32
    %c0_i32_0 = arith.constant 0 : i32
    return %arg0, %c0_i32, %arg1 : i32, i32, i32
  }
}

</mosaic_0001>

<bundles_post_ra>
// kernel: conv_block_forward.1
= control target key start
LH: loop header
LB: loop body
LE: loop exit
PB: predicated region body
PF: predicated region fallthrough
CT: control target
= control target key end

     0   :  { %9 = vsyncpa [#allocation5], 0  ;;  %s1243_s0 = inlined_call_operand.vmem [shape: bf16[2,32,256], index: 0, kind: input, shape index: {}, may-alias: {0,1}]   ;;  %s1244_s1 = inlined_call_operand.vmem [shape: bf16[2,32,256], index: 1, kind: input, shape index: {}, may-alias: {0,1}]   ;;  %s1245_s2 = inlined_call_operand.vmem [shape: bf16[4,16,32], index: 2, kind: input, shape index: {}]   ;;  %s1246_s3 = inlined_call_operand.vmem [shape: f32[16,1], index: 3, kind: input, shape index: {}]   ;;  %s1247_s4 = inlined_call_operand.hbm [shape: f32[2,16,128], index: 4, kind: output, shape index: {}]  }
   0x1   :  { %11 = vsyncpa [#allocation5 + $0x1], 0  ;;  %s1059_s15 = smov 0   ;;  %s1061_s16 = smov 0  }
   0x2   :  { %s1063_s17 = smov 0   ;;  %s1065_s18 = smov 0  }
   0x3   :  { %s1067_s19 = smov 0   ;;  %s1069_s20 = smov 0  }
   0x4 LB: > { %s780_s21 = sadd.s32 4294967295, %s1023_s20   ;;  %s781_s22 = sadd.s32 4294967294, %s1023_s20   ;;  %s1023_s20 = sphi %s1069_s20, %s17_s20   ;;  %s1019_s19 = sphi %s1067_s19, %s1255_s19   ;;  %s1015_s18 = sphi %s1065_s18, %s1254_s18   ;;  %s1011_s17 = sphi %s1063_s17, %s1253_s17   ;;  %s1007_s16 = sphi %s1061_s16, %s1252_s16   ;;  %s1003_s15 = sphi %s1059_s15, %s1251_s15  }
   0x5   : > { %s29_s23 = sadd.s32 1, %s1019_s19  ;;  %s38_s24 = sadd.s32 1, %s1011_s17 }
   0x6   : > { %p31_p0 = scmp.ge.s32.totalorder %s29_s23, 2  ;;  %p45_p1 = scmp.ne.s32.totalorder %s1011_s17, %s1007_s16 }
   0x7   : > { %p46_p2 = scmp.eq.s32.totalorder %s1023_s20, 0  ;;  %p149_p3 = scmp.eq.s32.totalorder %s780_s21, 1 }
   0x8   : > { %s1257_s23 = smov (%p31_p0, %s29_s23), 0  ;;  %p154_p6 = scmp.ne.s32.totalorder %s1007_s16, %s1003_s15 }
   0x9   : > { %p1098_p4 = por %p46_p2, %p45_p1  ;;  %p1102_p5 = por %p149_p3, %p45_p1 }
   0xa   : > { %s33_s27 = ssub.s32 %s1019_s19, %s1257_s23  ;;  %p155_p8 = scmp.eq.s32.totalorder %s781_s22, 1 }
   0xb   : > { %p36_p7 = scmp.eq.s32.totalorder %s33_s27, 0  ;;  %p783_p10 = scmp.ge.s32.totalorder %s1023_s20, 2 }
   0xc   : > { %p1113_p9 = por %p155_p8, %p154_p6 }
   0xd   : > { %s1111_s28 = scalar_select %p36_p7, %s1011_s17, %s38_s24  }
   0xe   : > { %177 = sbr.rel (%p783_p10) target bundleno = 35 (0x23), region = 24 }
  0x15   : > { %180 = sbr.rel (!%p1098_p4) target bundleno = 28 (0x1c), region = 28  ;;  %s182_s30 = sand.u32 (%p1098_p4), 1, %s1011_s17  }
  0x16   : > { %s821_s5 = sshll.u32 (%p1098_p4), %s1019_s19, 5  ;;  %s784_s6 = sshll.u32 (%p1098_p4), %s182_s30, 4 }
  0x17   : > { %s188_s9 = scalar_lea.vmem (%p1098_p4), %s1243_s0, %s821_s5  ;;  %s184_s10 = scalar_lea.vmem (%p1098_p4), [#allocation2], %s784_s6 }
  0x18   : > { %v204_v0 = vld [vmem:[%s188_s9] sm:$0xf] (%p1098_p4)  ;;  %v206_v1 = vld [vmem:[%s188_s9 + $0x8] sm:$0xf] (%p1098_p4)  ;;  %v208_v2 = vld [vmem:[%s188_s9 + $0x10] sm:$0xf] (%p1098_p4) }
  0x19   : > { %205 = vst [vmem:[%s184_s10] sm:$0xf] (%p1098_p4), %v204_v0  ;;  %207 = vst [vmem:[%s184_s10 + $0x4] sm:$0xf] (%p1098_p4), %v206_v1  ;;  %v210_v3 = vld [vmem:[%s188_s9 + $0x18] sm:$0xf] (%p1098_p4) }
  0x1a   : > { %209 = vst [vmem:[%s184_s10 + $0x8] sm:$0xf] (%p1098_p4), %v208_v2  ;;  %211 = vst [vmem:[%s184_s10 + $0xc] sm:$0xf] (%p1098_p4), %v210_v3 }
  0x1c PF: > { %242 = sbr.rel (!%p1098_p4) target bundleno = 35 (0x23), region = 69  ;;  %s244_s11 = sand.u32 (%p1098_p4), 1, %s1011_s17  }
  0x1d   : > { %s822_s12 = sshll.u32 (%p1098_p4), %s1019_s19, 5  ;;  %s787_s13 = sshll.u32 (%p1098_p4), %s244_s11, 4 }
  0x1e   : > { %s714_s22 = scalar_lea.vmem (%p1098_p4), %s1244_s1, %s822_s12  ;;  %s246_s24 = scalar_lea.vmem (%p1098_p4), [#allocation3], %s787_s13 }
  0x1f   : > { %v790_v4 = vld [vmem:[%s714_s22 + $0x4] sm:$0xf] (%p1098_p4)  ;;  %v791_v5 = vld [vmem:[%s714_s22 + $0xc] sm:$0xf] (%p1098_p4)  ;;  %v792_v6 = vld [vmem:[%s714_s22 + $0x14] sm:$0xf] (%p1098_p4) }
  0x20   : > { %268 = vst [vmem:[%s246_s24] sm:$0xf] (%p1098_p4), %v790_v4  ;;  %270 = vst [vmem:[%s246_s24 + $0x4] sm:$0xf] (%p1098_p4), %v791_v5  ;;  %v793_v7 = vld [vmem:[%s714_s22 + $0x1c] sm:$0xf] (%p1098_p4) }
  0x21   : > { %272 = vst [vmem:[%s246_s24 + $0x8] sm:$0xf] (%p1098_p4), %v792_v6  ;;  %274 = vst [vmem:[%s246_s24 + $0xc] sm:$0xf] (%p1098_p4), %v793_v7 }
  0x23 PF: > { %p794_p11 = scmp.ge.s32.totalorder %s1023_s20, 1  ;;  %p304_p12 = scmp.lt.s32.totalorder %s1023_s20, 3 }
  0x25   : > { %p305_p13 = pnand %p794_p11, %p304_p12 }
  0x26   : > { %s311_s25 = sand.u32 (!%p305_p13), 1, %s1007_s16   ;;  %v1025_v8 = vmov (!%p305_p13), 0.0   ;;  %vm1026_vm0 = vmmov (!%p305_p13), 0   ;;  %s1027_s5 = smov (!%p305_p13), 127   ;;  %v938_v13 = vld [vmem:[%s1245_s2] sm:$0xff] (!%p305_p13)   ;;  %vm402_vm1 = vcmask (!%p305_p13), 261120  }
  0x27   : > { %308 = sbr.rel (%p305_p13) target bundleno = 440 (0x1b8), region = 110  ;;  %s1139_s27 = sshll.u32 (!%p305_p13), %s311_s25, 4  ;;  %836 = vmatprep.subr.bf16.mxu0 (!%p305_p13), %v1025_v8  ;;  %844 = vmatprep.subr.bf16.mxu1 (!%p305_p13), %v1025_v8  ;;  %v1030_v14 = vmov (!%p305_p13), 0   ;;  %v631_v15 = vld [vmem:[%s1246_s3 + $0x8] sm:$0xff] (!%p305_p13)  ;;  %v630_v16 = vld [vmem:[%s1246_s3] sm:$0xff] (!%p305_p13)  ;;  %vm397_vm2 = vcmask (!%p305_p13), 1039360  }
  0x28   : > { %s313_s30 = scalar_lea.vmem (!%p305_p13), [#allocation2], %s1139_s27  ;;  %840 = vmatprep.mubr.msk.bf16.mxu0 (!%p305_p13), %vm1026_vm0, %v1025_v8  ;;  %848 = vmatprep.mubr.msk.bf16.mxu1 (!%p305_p13), %vm1026_vm0, %v1025_v8  ;;  %s320_s6 = scalar_lea.vmem (!%p305_p13), [#allocation3], %s1139_s27  ;;  %v937_v25 = vld [vmem:[%s1245_s2 + $0x8] sm:$0xff] (!%p305_p13)   ;;  %vm512_vm3 = vcmask (!%p305_p13), 1031168   ;;  %vm579_vm4 = vcmask (!%p305_p13), 1022976   ;;  %v939_v33 = vld [vmem:[%s1245_s2 + $0x10] sm:$0xff] (!%p305_p13)  }
  0x29   : > { %v933_v9 = vld [vmem:[%s313_s30 + $0x8] sm:$0xff] (!%p305_p13)   ;;  %v934_v10 = vld [vmem:[%s313_s30] sm:$0xff] (!%p305_p13)   ;;  %s1028_s9 = smov (!%p305_p13), 126   ;;  %s1029_s10 = smov (!%p305_p13), 125   ;;  %932 = vset.pattern.permute.xlu1 (!%p305_p13), %v1030_v14  ;;  %931 = vset.pattern.permute.xlu0 (!%p305_p13), %v1030_v14 }
  0x2a   : > { %393 = vrot.lane.b32.xlu1 (!%p305_p13), %v933_v9, %s1027_s5  ;;  %v935_v11 = vld [vmem:[%s320_s6 + $0x8] sm:$0xff] (!%p305_p13)   ;;  %389 = vrot.lane.b32.xlu0 (!%p305_p13), %v934_v10, %s1027_s5  ;;  %v936_v12 = vld [vmem:[%s320_s6] sm:$0xff] (!%p305_p13)   ;;  %s823_s7 = sshll.u32 (!%p305_p13), %s1015_s18, 8  ;;  %s346_s8 = scalar_lea.vmem (!%p305_p13), [#allocation4], %s1139_s27 }
  0x2b   : > { %845 = vmatpush3.bf16.msra.mxu1 (!%p305_p13), %v934_v10  ;;  %v940_v37 = vld [vmem:[%s1245_s2 + $0x18] sm:$0xff] (!%p305_p13)   ;;  %s1190_s12 = scalar_lea.hbm (!%p305_p13), %s1247_s4, %s823_s7  ;;  %s1196_s18 = scalar_lea.sflag (!%p305_p13), [#allocation5], %s311_s25 }
  0x2c   : > { %846 = vmatprep.subr.bf16.mxu1 (!%p305_p13), %v1025_v8  ;;  %s1031_s13 = smov (!%p305_p13), [#allocation4]  }
  0x2d   : > { %s949_s14 = sshll.u32 (!%p305_p13), %s1031_s13, 4  ;;  %s950_s14 = int_to_ptr.vmem [resolvable:$false] %s949_s14 }
  0x2e   : > { %395 = vrot.lane.b32.xlu1 %v935_v11, %s1027_s5  ;;  %391 = vrot.lane.b32.xlu0 %v936_v12, %s1027_s5  ;;  %s951_s21 = scalar_lea.vmem %s950_s14, 512 }
  0x2f   : > { %847 = vmatpush3.bf16.msra.mxu1 %v933_v9 }
  0x30   : > { %860 = vmatprep.subr.bf16.mxu1 %v1025_v8 }
  0x32   : > { %506 = vrot.lane.b32.xlu1 %v936_v12, %s1028_s9  ;;  %849 = vmatmul.mubr.msk.bf16.vlgmr.msra.gmra.mrb[0].mxu1 %vm402_vm1, %v938_v13 }
  0x33   : > { %504 = vrot.lane.b32.xlu0 %v934_v10, %s1028_s9  ;;  %864 = vmatprep.mubr.msk.bf16.mxu1 %vm1026_vm0, %v1025_v8 }
  0x36   : > { %573 = vrot.lane.b32.xlu1 %v936_v12, %s1029_s10 }
  0x37   : > { %571 = vrot.lane.b32.xlu0 %v934_v10, %s1029_s10 }
  0x3a   : > { %510 = vrot.lane.b32.xlu1 %v935_v11, %s1028_s9 }
  0x3b   : > { %508 = vrot.lane.b32.xlu0 %v933_v9, %s1028_s9  ;;  %s679_s9 = sshll.u32 %s346_s8, 4  ;;  %s1192_s9 = int_to_ptr.vmem [resolvable:$true] %s679_s9 }
  0x3c   : > { %s945_s27 = scalar_lea.vmem %s1192_s9, 256  ;;  %p952_p3 = scmp.lt.s32.totalorder %s1192_s9, %s950_s14 }
  0x3d   : > { %p946_p0 = scmp.ne.s32.totalorder %s1192_s9, %s945_s27  ;;  %p953_p4 = scmp.lt.s32.totalorder %s951_s21, %s945_s27 }
  0x3e   : > { %577 = vrot.lane.b32.xlu1 %v935_v11, %s1029_s10 }
  0x3f   : > { %575 = vrot.lane.b32.xlu0 %v933_v9, %s1029_s10  ;;  %p947_p1 = pnand %p946_p0, %p1102_p5  ;;  %p954_p6 = por %p953_p4, %p952_p3 }
  0x41   : > { %p948_p2 = pneg %p947_p1 }
  0x42   : > { %639 = vperm.xlu1 %932, %v631_v15  }
  0x43   : > { %634 = vperm.xlu0 %931, %v630_v16   ;;  %p955_p7 = pnand %p954_p6, %p948_p2 }
  0x9c   : > { %v394_v17 = vpop.permute.xlu1 %393  ;;  %v390_v18 = vpop.permute.xlu0 %389 }
  0xa0   : > { %v396_v19 = vpop.permute.xlu1 %395  ;;  %v392_v20 = vpop.permute.xlu0 %391 }
  0xa1   : > { %v398_v21 = vsel %vm397_vm2, %v390_v18, %v392_v20  ;;  %v399_v24 = vsel %vm397_vm2, %v394_v17, %v396_v19 }
  0xa2   : > { %837 = vmatpush3.bf16.msra.mxu0 %v398_v21 }
  0xa3   : > { %838 = vmatprep.subr.bf16.mxu0 %v1025_v8 }
  0xa4   : > { %v507_v22 = vpop.permute.xlu1 %506 }
  0xa5   : > { %v505_v23 = vpop.permute.xlu0 %504 }
  0xa6   : > { %839 = vmatpush3.bf16.msra.mxu0 %v399_v24  ;;  %v513_v28 = vsel %vm512_vm3, %v505_v23, %v507_v22 }
  0xa7   : > { %852 = vmatprep.subr.bf16.mxu0 %v1025_v8 }
  0xa8   : > { %v574_v26 = vpop.permute.xlu1 %573 }
  0xa9   : > { %v572_v27 = vpop.permute.xlu0 %571  ;;  %841 = vmatmul.mubr.msk.bf16.vlgmr.msra.gmra.mrb[0].mxu0 %vm402_vm1, %v937_v25 }
  0xaa   : > { %v580_v29 = vsel %vm579_vm4, %v572_v27, %v574_v26  ;;  %853 = vmatpush3.bf16.msra.mxu0 %v513_v28  ;;  %856 = vmatprep.mubr.msk.bf16.mxu0 %vm1026_vm0, %v1025_v8 }
  0xab   : > { %861 = vmatpush3.bf16.msra.mxu1 %v580_v29  ;;  %854 = vmatprep.subr.bf16.mxu0 %v1025_v8 }
  0xac   : > { %v511_v30 = vpop.permute.xlu1 %510  ;;  %862 = vmatprep.subr.bf16.mxu1 %v1025_v8 }
  0xad   : > { %v509_v31 = vpop.permute.xlu0 %508 }
  0xae   : > { %v514_v32 = vsel %vm512_vm3, %v509_v31, %v511_v30 }
  0xaf   : > { %855 = vmatpush3.bf16.msra.mxu0 %v514_v32 }
  0xb0   : > { %v578_v34 = vpop.permute.xlu1 %577 }
  0xb1   : > { %v576_v35 = vpop.permute.xlu0 %575 }
  0xb2   : > { %v581_v36 = vsel %vm579_vm4, %v576_v35, %v578_v34  ;;  %857 = vmatmul.mubr.msk.bf16.vlgmr.msra.gmra.mrb[4].mxu0 %vm402_vm1, %v939_v33 }
  0xb3   : > { %863 = vmatpush3.bf16.msra.mxu1 %v581_v36 }
  0xb6   : > { %865 = vmatmul.mubr.msk.bf16.vlgmr.msra.gmra.mrb[4].mxu1 %vm402_vm1, %v940_v37 }
  0xc1   : > { %v640_v59 = vpop.permute.xlu1 %639 }
  0xc2   : > { %v635_v55 = vpop.permute.xlu0 %634 }
 0x105   : > { %v489_v38 = vpop.f32.mrb[0].mxu1 }
 0x106   : > { %v850_v39 = vpop.f32.mrb[1].mxu1 }
 0x107   : > { %v492_v40 = vpop.f32.mrb[2].mxu1 }
 0x108   : > { %v851_v41 = vpop.f32.mrb[3].mxu1 }
 0x17c   : > { %v440_v42 = vpop.f32.mrb[0].mxu0 }
 0x17d   : > { %v842_v43 = vpop.f32.mrb[1].mxu0  ;;  %v490_v44 = vadd.f32 %v489_v38, %v440_v42 }
 0x17e   : > { %v443_v45 = vpop.f32.mrb[2].mxu0 }
 0x17f   : > { %v843_v46 = vpop.f32.mrb[3].mxu0  ;;  %v493_v47 = vadd.f32 %v492_v40, %v443_v45 }
 0x185   : > { %v554_v48 = vpop.f32.mrb[4].mxu0 }
 0x186   : > { %v561_v49 = vadd.f32 %v554_v48, %v490_v44  ;;  %v858_v50 = vpop.f32.mrb[5].mxu0 }
 0x187   : > { %v557_v51 = vpop.f32.mrb[6].mxu0 }
 0x188   : > { %v562_v52 = vadd.f32 %v557_v51, %v493_v47  ;;  %v859_v53 = vpop.f32.mrb[7].mxu0 }
 0x189   : > { %v621_v54 = vpop.f32.mrb[4].mxu1 }
 0x18a   : > { %v628_v56 = vadd.f32 %v621_v54, %v561_v49  ;;  %v866_v57 = vpop.f32.mrb[5].mxu1 }
 0x18b   : > { %v624_v58 = vpop.f32.mrb[6].mxu1 }
 0x18c   : > { %v642_v60 = vadd.f32 %v635_v55, %v628_v56  ;;  %v629_v61 = vadd.f32 %v624_v58, %v562_v52  ;;  %v867_v62 = vpop.f32.mrb[7].mxu1 }
 0x18e   : > { %v646_v63 = vmul.f32 0.044715, %v642_v60  ;;  %v643_v0 = vadd.f32 %v640_v59, %v629_v61  ;;  %v644_v11 = vmul.f32 0.5, %v642_v60 }
 0x190   : > { %v648_v1 = vmul.f32 %v646_v63, %v642_v60  ;;  %v647_v2 = vmul.f32 0.044715, %v643_v0  ;;  %v645_v14 = vmul.f32 0.5, %v643_v0 }
 0x192   : > { %v650_v3 = vmul.f32 %v648_v1, %v642_v60  ;;  %v649_v4 = vmul.f32 %v647_v2, %v643_v0 }
 0x194   : > { %v652_v5 = vadd.f32 %v650_v3, %v642_v60  ;;  %v651_v6 = vmul.f32 %v649_v4, %v643_v0 }
 0x196   : > { %v654_v7 = vmul.f32 0.7978846, %v652_v5  ;;  %v653_v8 = vadd.f32 %v651_v6, %v643_v0 }
 0x198   : > { %941 = vtanh.f32 %v654_v7  ;;  %v655_v9 = vmul.f32 0.7978846, %v653_v8 }
 0x19a   : > { %943 = vtanh.f32 %v655_v9 }
 0x1a2   : > { %v942_v10 = vpop.eup %941 }
 0x1a3   : > { %v658_v12 = vadd.f32 1.0, %v942_v10 }
 0x1a4   : > { %v944_v13 = vpop.eup %943 }
 0x1a5   : > { %v659_v15 = vadd.f32 1.0, %v944_v13  ;;  %v660_v16 = vmul.f32 %v658_v12, %v644_v11 }
 0x1a7   : > { %v661_v17 = vmul.f32 %v659_v15, %v645_v14  ;;  %662 = vst [vmem:[%s346_s8] sm:$0xff] %v660_v16 }
 0x1a9   : > { %663 = vst [vmem:[%s346_s8 + $0x8] sm:$0xff] %v661_v17 }
 0x1aa   : > { %958 = shalt.err (!%p955_p7)
}
 0x1ab   : > { %s959_s25 = scalar_lea.hbm %s1190_s12, 256  ;;  %s963_s30 = scalar_lea.hbm %s1247_s4, 512 }
 0x1ac   : > { %p960_p8 = scmp.ne.s32.totalorder %s1190_s12, %s959_s25  ;;  %p964_p13 = scmp.lt.u32.totalorder %s1190_s12, %s1247_s4 }
 0x1ad   : > { %p965_p0 = scmp.lt.u32.totalorder %s963_s30, %s959_s25  ;;  %p967_p2 = scmp.lt.u32.totalorder %s959_s25, %s1190_s12 }
 0x1ae   : > { %p961_p11 = pnand %p960_p8, %p1102_p5 }
 0x1af   : > { %p966_p1 = por %p965_p0, %p964_p13 }
 0x1b0   : > { %p962_p12 = pneg %p961_p11 }
 0x1b1   : > { %p968_p3 = por %p967_p2, %p966_p1 }
 0x1b3   : > { %p969_p4 = pnand %p968_p3, %p962_p12 }
 0x1b5   : > { %972 = shalt.err (!%p969_p4)
}
 0x1b6   : > { %s1032_s7 = smov 128   ;;  %s1033_s8 = smov 8  }
 0x1b7   : > { %868 = dma.vmem_to_hbm [thread:$0]  (%p1102_p5), %s1192_s9, 256, %s1190_s12, %s1196_s18, %s1032_s7, %s1032_s7, %s1033_s8  }
 0x1b8 PF: > { %s694_s10 = sand.u32 1, %s1003_s15   ;;  %p871_p6 = pnand %p783_p10, %p1113_p9 }
 0x1b9   : > { %s695_s11 = scalar_lea.sflag [#allocation5], %s694_s10 }
 0x1ba   : > { %998 = dma.done.wait (!%p871_p6), %s695_s11, 256  }
 0x1bb   : > { %1000 = vsyncadd (!%p871_p6), %s695_s11, 4294967040  ;;  %s17_s20 = sadd.s32 1, %s1023_s20   ;;  %s1251_s15 = smov %s1007_s16 }
 0x1bc   : > { %p14_p7 = scmp.ge.s32.totalorder %s17_s20, 4   ;;  %s1252_s16 = smov %s1011_s17 }
 0x1bd   : > { %s1253_s17 = smov %s1111_s28  ;;  %s1254_s18 = smov %s1019_s19 }
 0x1be   : > { %s1255_s19 = smov %s1257_s23  ;;  %16 = sbr.rel (!%p14_p7) target bundleno = 4 (0x4), region = 169 }
 0x1c5   :  { %700 = vsyncpa [#allocation5], 1 }
 0x1c6   :  { %702 = vsyncpa [#allocation5 + $0x1], 1 }

</bundles_post_ra>
